<compile_context>
chip_gen: v5e
topology: v5e:2x2
jax: 0.10.0
libtpu: 0.0.40
codegen_flags: <defaults>
</compile_context>

<pallas_src>
import functools

import jax
import jax.numpy as jnp
from jax.experimental import pallas as pl
from jax.experimental.pallas import tpu as pltpu


def _scale_mul_kernel(scale_ref, x_ref, o_ref, *, c_blk):
    # scale_ref: (nc_pad, 1) -- resident across all grid steps (fetched once).
    # x_ref / o_ref: (c_blk, hw) per-step tiles (lane-dense spatial axis).
    i = pl.program_id(0)
    start = pl.multiple_of(i * c_blk, c_blk)      # c_blk is a sublane multiple
    s = scale_ref[pl.ds(start, c_blk), :]         # (c_blk, 1) column
    o_ref[...] = s * x_ref[...]                   # lane-broadcast VPU multiply


def _sublane_multiple(dtype) -> int:
    # Packed dtypes need 16 (bf16) / 32 (int8, fp8) sublanes per tile; f32 -> 8.
    return max(8, 32 // jnp.dtype(dtype).itemsize)


def _num_steps() -> int:
    """Target grid-step count per generation: ~4 on v7x (2 TCs -> 2 steps/core
    keeps the per-core software pipeline alive), 2 on v5e/v6e (step overhead
    dominates this tiny op, so don't go finer)."""
    try:
        kind = jax.devices()[0].device_kind.lower()
    except Exception:
        kind = ""
    return 4 if "v7" in kind else 2


def _pick_c_block(nc: int, steps: int, sub: int) -> int:
    """Channel-block size: a multiple of the sublane packing giving ~`steps`
    grid steps."""
    if nc <= sub:
        return nc                         # full dim -> exempt from (8,128) rule
    blk = -(-nc // steps)                 # ceil(nc / steps)
    blk = -(-blk // sub) * sub            # round up to sublane multiple
    return min(blk, -(-nc // sub) * sub)


def channel_scale_mul(x34, x29):
    """Computes x34 * x29 with x34: (N, C, 1, 1), x29: (N, C, H, W)."""
    n, c, h, w = x29.shape
    assert x34.shape == (n, c, 1, 1)

    nc, hw = n * c, h * w                 # fold batch into the channel axis
    x_flat = x29.reshape(nc, hw)          # lane-dense spatial axis (free view)
    s_flat = x34.reshape(nc, 1)

    sub = _sublane_multiple(x29.dtype)
    c_blk = _pick_c_block(nc, _num_steps(), sub)
    grid_steps = pl.cdiv(nc, c_blk)

    # Pad the (tiny) resident scale so the in-kernel ds slice on the last
    # (masked) partial block never reads past the VMEM allocation.
    nc_pad = grid_steps * c_blk
    if nc_pad != nc:
        s_flat = jnp.pad(s_flat, ((0, nc_pad - nc), (0, 0)))

    itemsize = jnp.dtype(x29.dtype).itemsize
    kernel = functools.partial(_scale_mul_kernel, c_blk=c_blk)

    out_flat = pl.pallas_call(
        kernel,
        out_shape=jax.ShapeDtypeStruct((nc, hw), x29.dtype),
        grid_spec=pltpu.PrefetchScalarGridSpec(
            num_scalar_prefetch=0,
            grid=(grid_steps,),
            in_specs=[
                # Whole-array, constant index -> scale stays resident in VMEM.
                pl.BlockSpec((nc_pad, 1), lambda i: (0, 0)),
                pl.BlockSpec((c_blk, hw), lambda i: (i, 0)),
            ],
            out_specs=pl.BlockSpec((c_blk, hw), lambda i: (i, 0)),
        ),
        # Channel blocks are independent -> "parallel" lets v7x shard the axis
        # across its two TensorCores (no effect on v5e/v6e).
        # TODO(synk): if a v7x profile shows one idle core, switch this axis to
        # pltpu.CORE_PARALLEL (or an explicit core_map).
        compiler_params=pltpu.CompilerParams(
            dimension_semantics=("parallel",),
        ),
        # In-place elementwise multiply into x29's buffer (input index 1).
        input_output_aliases={1: 0},
        # Advisory: tiny, bandwidth-bound op.
        cost_estimate=pl.CostEstimate(
            flops=nc * hw,
            transcendentals=0,
            bytes_accessed=(2 * nc * hw + nc) * itemsize,
        ),
    )(s_flat, x_flat)

    return out_flat.reshape(n, c, h, w)


if __name__ == "__main__":
    key = jax.random.PRNGKey(0)
    k1, k2 = jax.random.split(key)
    # Shapes implied by the module's forward: x29 (1,104,28,28), x34 (1,104,1,1)
    x29 = jax.random.normal(k1, (1, 104, 28, 28), dtype=jnp.float32)
    x34 = jax.random.normal(k2, (1, 104, 1, 1), dtype=jnp.float32)

    # Reference (plain-JAX broadcasting == PyTorch semantics), computed and
    # materialized BEFORE donating x29's buffer to the kernel output.
    ref = jax.block_until_ready(x34 * x29)

    # Donate x29 at the jit boundary so input_output_aliases actually avoids
    # the second NCHW allocation (x29 must not be reused by the caller after).
    fn = jax.jit(channel_scale_mul, donate_argnums=(1,))
    out = jax.block_until_ready(fn(x34, x29))

    assert out.shape == ref.shape == (1, 104, 28, 28)
    assert jnp.allclose(out, ref, atol=1e-6, rtol=1e-6)

    print("KERNEL_OK")
</pallas_src>

<mosaic_0001>
module attributes {stable_mosaic.version = 11 : i64} {
  func.func @_scale_mul_kernel(%arg0: i32, %arg1: memref<112x1xf32, #tpu.memory_space<vmem>>, %arg2: memref<56x784xf32, #tpu.memory_space<vmem>>, %arg3: memref<56x784xf32, #tpu.memory_space<vmem>>) attributes {dimension_semantics = [#tpu.dimension_semantics<parallel>], iteration_bounds = array<i64: 2>, scalar_prefetch = 0 : i64, scratch_operands = 0 : i64, tpu.core_type = #tpu.core_type<tc>, window_params = [{pipeline_mode = #tpu.pipeline_mode<synchronous>, transform_indices = @transform_0, window_bounds = array<i64: 112, 1>}, {transform_indices = @transform_1, window_bounds = array<i64: 56, 784>}, {transform_indices = @transform_2, window_bounds = array<i64: 56, 784>}]} {
    %c56_i32 = arith.constant 56 : i32
    %0 = arith.muli %arg0, %c56_i32 : i32
    %1 = tpu.assume_multiple %0, 56 : i32
    %2 = arith.index_cast %1 : i32 to index
    %c0 = arith.constant 0 : index
    %3 = vector.load %arg1[%2, %c0] : memref<112x1xf32, #tpu.memory_space<vmem>>, vector<56x1xf32>
    %c0_0 = arith.constant 0 : index
    %c0_1 = arith.constant 0 : index
    %4 = vector.load %arg2[%c0_0, %c0_1] : memref<56x784xf32, #tpu.memory_space<vmem>>, vector<56x784xf32>
    %5 = vector.broadcast %3 : vector<56x1xf32> to vector<56x784xf32>
    %6 = arith.mulf %5, %4 : vector<56x784xf32>
    %c0_2 = arith.constant 0 : index
    %c0_3 = arith.constant 0 : index
    %7 = vector.load %arg3[%c0_2, %c0_3] : memref<56x784xf32, #tpu.memory_space<vmem>>, vector<56x784xf32>
    tpu.vector_store %arg3[%c0_2, %c0_3], %6 {strides = array<i32>} : memref<56x784xf32, #tpu.memory_space<vmem>>, vector<56x784xf32>,
    return
  }
  func.func @transform_0(%arg0: i32) -> (i32, i32) {
    %c0_i32 = arith.constant 0 : i32
    %c0_i32_0 = arith.constant 0 : i32
    %c0_i32_1 = arith.constant 0 : i32
    return %c0_i32, %c0_i32_0 : i32, i32
  }
  func.func @transform_1(%arg0: i32) -> (i32, i32) {
    %c0_i32 = arith.constant 0 : i32
    %c0_i32_0 = arith.constant 0 : i32
    return %arg0, %c0_i32 : i32, i32
  }
  func.func @transform_2(%arg0: i32) -> (i32, i32) {
    %c0_i32 = arith.constant 0 : i32
    %c0_i32_0 = arith.constant 0 : i32
    return %arg0, %c0_i32 : i32, i32
  }
}

</mosaic_0001>

<bundles_post_ra>
// kernel: channel_scale_mul.1
= control target key start
LH: loop header
LB: loop body
LE: loop exit
PB: predicated region body
PF: predicated region fallthrough
CT: control target
= control target key end

     0   :  { %s828_s9 = smov 0   ;;  %s830_s10 = smov 0   ;;  %s1155_s0 = inlined_call_operand.vmem [shape: f32[112,1], index: 0, kind: input, shape index: {}]   ;;  %s1156_s1 = inlined_call_operand.vmem [shape: f32[104,784], index: 1, kind: input, shape index: {}, may-alias: {1,2}]   ;;  %s1157_s2 = inlined_call_operand.vmem [shape: f32[104,784], index: 2, kind: output, shape index: {}, may-alias: {1,2}]  }
   0x1   :  { %s832_s11 = smov 0  }
   0x2 LB: > { %s841_s12 = sadd.s32 4294967295, %s778_s11   ;;  %s843_s13 = sadd.s32 1, %s778_s11   ;;  %s778_s11 = sphi %s832_s11, %s1169_s11   ;;  %s774_s10 = sphi %s830_s10, %s1168_s10   ;;  %s770_s9 = sphi %s828_s9, %s1167_s9  }
   0x3   : > { %s63_s14 = ssub.s32 %s778_s11, %s843_s13  ;;  %s66_s15 = sadd.s32 1, %s774_s10 }
   0x4   : > { %p64_p0 = scmp.eq.s32.totalorder %s63_s14, 0  ;;  %p76_p1 = scmp.ne.s32.totalorder %s774_s10, %s770_s9 }
   0x5   : > { %p77_p2 = scmp.eq.s32.totalorder %s841_s12, 1  ;;  %p608_p3 = scmp.ge.s32.totalorder %s778_s11, 1 }
   0x6   : > { %s851_s16 = scalar_select %p64_p0, %s774_s10, %s66_s15  }
   0x7   : > { %p853_p4 = por %p77_p2, %p76_p1  ;;  %p124_p5 = scmp.lt.s32.totalorder %s778_s11, 3 }
   0x9   : > { %p125_p6 = pnand %p608_p3, %p124_p5 }
   0xa   : > { %s174_s18 = smul.u32 (!%p125_p6), 56, %s841_s12  ;;  %s148_s25 = sand.u32 (!%p125_p6), 1, %s770_s9  }
   0xb   : > { %128 = sbr.rel (%p125_p6) target bundleno = 253 (0xfd), region = 28 }
   0xc   : > { %s175_s21 = scalar_lea.vmem (!%p125_p6), %s1155_s0, %s174_s18  ;;  %s862_s22 = smul.u32 (!%p125_p6), 7, %s841_s12 }
   0xd   : > { %s621_s29 = smul.u32 (!%p125_p6), 392, %s148_s25 }
   0xe   : > { %p157_p7 = scmp.lt.s32.totalorder (!%p125_p6), %s862_s22, 12 }
   0xf   : > { %s879_s30 = scalar_lea.vmem (!%p125_p6), [#allocation2], %s621_s29  }
  0x10   : > { %v812_v0 = vmov 0   ;;  %v178_v1 = vld [vmem:[%s175_s21 + $0x10] sm:$0xff]  ;;  %v176_v2 = vld [vmem:[%s175_s21] sm:$0xff]  ;;  %v179_v4 = vld [vmem:[%s175_s21 + $0x18] sm:$0xff]  ;;  %s158_s23 = scalar_select %p157_p7, %s862_s22, 12  ;;  %vm322_vm0 = vcmask 130048  }
  0x11   : > { %716 = vset.pattern.permute.xlu1 %v812_v0  ;;  %715 = vset.pattern.permute.xlu0 %v812_v0  ;;  %v180_v3 = vld [vmem:[%s175_s21 + $0x20] sm:$0xff]  ;;  %v177_v5 = vld [vmem:[%s175_s21 + $0x8] sm:$0xff]  ;;  %v182_v7 = vld [vmem:[%s175_s21 + $0x30] sm:$0xff]  ;;  %s374_s3 = ssub.s32 (%p853_p4), 13, %s862_s22  ;;  %s624_s4 = smul.u32 (%p853_p4), 392, %s841_s12 }
  0x12   : > { %717 = vset.pattern.permute.xlu2 %v812_v0  ;;  %244 = vperm.xlu1 %716, %v178_v1   ;;  %v181_v6 = vld [vmem:[%s175_s21 + $0x28] sm:$0xff]  ;;  %s622_s24 = smul.u32 56, %s158_s23  ;;  %p375_p8 = scmp.lt.s32.totalorder (%p853_p4), %s374_s3, 7 }
  0x13   : > { %234 = vperm.xlu0 %715, %v176_v2   ;;  %254 = vperm.xlu2 %717, %v180_v3   ;;  %s986_s7 = scalar_lea.vmem (%p853_p4), %s1157_s2, %s624_s4  }
  0x14   : > { %s870_s28 = scalar_lea.vmem %s1156_s1, %s622_s24 }
  0x15   : > { %v211_v8 = vld [vmem:[%s870_s28 + $0xe0] sm:$0xff]  ;;  %v212_v9 = vld [vmem:[%s870_s28 + $0xe8] sm:$0xff]  ;;  %v213_v10 = vld [vmem:[%s870_s28 + $0xf0] sm:$0xff] }
  0x16   : > { %v214_v11 = vld [vmem:[%s870_s28 + $0xf8] sm:$0xff]  ;;  %v215_v13 = vld [vmem:[%s870_s28 + $0x100] sm:$0xff]  ;;  %v216_v14 = vld [vmem:[%s870_s28 + $0x108] sm:$0xff] }
  0x17   : > { %v217_v18 = vld [vmem:[%s870_s28 + $0x110] sm:$0xff]  ;;  %v218_v23 = vld [vmem:[%s870_s28 + $0x118] sm:$0xff]  ;;  %v219_v24 = vld [vmem:[%s870_s28 + $0x120] sm:$0xff] }
  0x18   : > { %v220_v25 = vld [vmem:[%s870_s28 + $0x128] sm:$0xff]  ;;  %v221_v27 = vld [vmem:[%s870_s28 + $0x130] sm:$0xff]  ;;  %v222_v28 = vld [vmem:[%s870_s28 + $0x138] sm:$0xff] }
  0x19   : > { %v223_v29 = vld [vmem:[%s870_s28 + $0x140] sm:$0xff]  ;;  %v224_v33 = vld [vmem:[%s870_s28 + $0x148] sm:$0xff]  ;;  %v197_v38 = vld [vmem:[%s870_s28 + $0x70] sm:$0xff] }
  0x1a   : > { %249 = vperm.xlu1 %716, %v179_v4   ;;  %v198_v39 = vld [vmem:[%s870_s28 + $0x78] sm:$0xff]  ;;  %v199_v40 = vld [vmem:[%s870_s28 + $0x80] sm:$0xff]  ;;  %v200_v41 = vld [vmem:[%s870_s28 + $0x88] sm:$0xff] }
  0x1b   : > { %239 = vperm.xlu0 %715, %v177_v5   ;;  %259 = vperm.xlu2 %717, %v181_v6   ;;  %v201_v43 = vld [vmem:[%s870_s28 + $0x90] sm:$0xff]  ;;  %v202_v44 = vld [vmem:[%s870_s28 + $0x98] sm:$0xff]  ;;  %v203_v48 = vld [vmem:[%s870_s28 + $0xa0] sm:$0xff] }
  0x1c   : > { %v183_v52 = vld [vmem:[%s870_s28] sm:$0xff]  ;;  %v184_v54 = vld [vmem:[%s870_s28 + $0x8] sm:$0xff]  ;;  %v185_v56 = vld [vmem:[%s870_s28 + $0x10] sm:$0xff] }
  0x1d   : > { %v186_v57 = vld [vmem:[%s870_s28 + $0x18] sm:$0xff]  ;;  %v187_v59 = vld [vmem:[%s870_s28 + $0x20] sm:$0xff]  ;;  %v188_v61 = vld [vmem:[%s870_s28 + $0x28] sm:$0xff] }
  0x1e   : > { %v189_v63 = vld [vmem:[%s870_s28 + $0x30] sm:$0xff]  ;;  %v204_v3 = vld [vmem:[%s870_s28 + $0xa8] sm:$0xff] }
  0x1f   : > { %v205_v5 = vld [vmem:[%s870_s28 + $0xb0] sm:$0xff] }
  0x23   : > { %264 = vperm.xlu0 %715, %v182_v7   ;;  %v206_v7 = vld [vmem:[%s870_s28 + $0xb8] sm:$0xff] }
  0x6d   : > { %v255_v12 = vpop.permute.xlu2 %254 }
  0x6e   : > { %v295_v15 = vmul.f32 %v255_v12, %v211_v8  ;;  %v296_v16 = vmul.f32 %v255_v12, %v212_v9  ;;  %v297_v17 = vmul.f32 %v255_v12, %v213_v10  ;;  %v298_v19 = vmul.f32 %v255_v12, %v214_v11  ;;  %v207_v8 = vld [vmem:[%s870_s28 + $0xc0] sm:$0xff]  ;;  %v208_v10 = vld [vmem:[%s870_s28 + $0xc8] sm:$0xff] }
  0x6f   : > { %v299_v20 = vmul.f32 %v255_v12, %v215_v13  ;;  %v300_v21 = vmul.f32 %v255_v12, %v216_v14  ;;  %v301_v22 = vmul.f32 %v255_v12, %v217_v18  ;;  %v209_v13 = vld [vmem:[%s870_s28 + $0xd0] sm:$0xff]  ;;  %v190_v18 = vld [vmem:[%s870_s28 + $0x38] sm:$0xff] }
  0x70   : > { %345 = vst [vmem:[%s879_s30 + $0xe0] sm:$0xff] %v295_v15  ;;  %v210_v15 = vld [vmem:[%s870_s28 + $0xd8] sm:$0xff] }
  0x71   : > { %346 = vst [vmem:[%s879_s30 + $0xe8] sm:$0xff] %v296_v16 }
  0x72   : > { %347 = vst [vmem:[%s879_s30 + $0xf0] sm:$0xff] %v297_v17 }
  0x73   : > { %348 = vst [vmem:[%s879_s30 + $0xf8] sm:$0xff] %v298_v19 }
  0x74   : > { %349 = vst [vmem:[%s879_s30 + $0x100] sm:$0xff] %v299_v20  ;;  %v191_v20 = vld [vmem:[%s870_s28 + $0x40] sm:$0xff] }
  0x75   : > { %350 = vst [vmem:[%s879_s30 + $0x108] sm:$0xff] %v300_v21  ;;  %v260_v26 = vpop.permute.xlu2 %259 }
  0x76   : > { %351 = vst.msk [vmem:[%s879_s30 + $0x110] sm:$0xff] %vm322_vm0, %v301_v22  ;;  %v302_v30 = vmul.f32 %v260_v26, %v218_v23  ;;  %v303_v31 = vmul.f32 %v260_v26, %v219_v24  ;;  %v304_v32 = vmul.f32 %v260_v26, %v220_v25  ;;  %v305_v34 = vmul.f32 %v260_v26, %v221_v27  ;;  %v192_v22 = vld [vmem:[%s870_s28 + $0x48] sm:$0xff]  ;;  %v193_v23 = vld [vmem:[%s870_s28 + $0x50] sm:$0xff]  ;;  %v194_v25 = vld [vmem:[%s870_s28 + $0x58] sm:$0xff] }
  0x77   : > { %v306_v35 = vmul.f32 %v260_v26, %v222_v28  ;;  %v307_v36 = vmul.f32 %v260_v26, %v223_v29  ;;  %v308_v37 = vmul.f32 %v260_v26, %v224_v33  ;;  %v195_v27 = vld [vmem:[%s870_s28 + $0x60] sm:$0xff]  ;;  %v196_v29 = vld [vmem:[%s870_s28 + $0x68] sm:$0xff]  ;;  %v225_v33 = vld [vmem:[%s870_s28 + $0x150] sm:$0xff] }
  0x78   : > { %352 = vst [vmem:[%s879_s30 + $0x118] sm:$0xff] %v302_v30 }
  0x79   : > { %353 = vst [vmem:[%s879_s30 + $0x120] sm:$0xff] %v303_v31 }
  0x7a   : > { %354 = vst [vmem:[%s879_s30 + $0x128] sm:$0xff] %v304_v32 }
  0x7b   : > { %355 = vst [vmem:[%s879_s30 + $0x130] sm:$0xff] %v305_v34 }
  0x7c   : > { %356 = vst [vmem:[%s879_s30 + $0x138] sm:$0xff] %v306_v35  ;;  %v226_v35 = vld [vmem:[%s870_s28 + $0x158] sm:$0xff] }
  0x7d   : > { %357 = vst [vmem:[%s879_s30 + $0x140] sm:$0xff] %v307_v36 }
  0x7e   : > { %358 = vst.msk [vmem:[%s879_s30 + $0x148] sm:$0xff] %vm322_vm0, %v308_v37  ;;  %v227_v37 = vld [vmem:[%s870_s28 + $0x160] sm:$0xff] }
  0x84   : > { %v245_v42 = vpop.permute.xlu1 %244 }
  0x85   : > { %v281_v45 = vmul.f32 %v245_v42, %v197_v38  ;;  %v282_v46 = vmul.f32 %v245_v42, %v198_v39  ;;  %v283_v47 = vmul.f32 %v245_v42, %v199_v40  ;;  %v284_v49 = vmul.f32 %v245_v42, %v200_v41  ;;  %v235_v51 = vpop.permute.xlu0 %234  ;;  %v228_v38 = vld [vmem:[%s870_s28 + $0x168] sm:$0xff]  ;;  %v229_v40 = vld [vmem:[%s870_s28 + $0x170] sm:$0xff] }
  0x86   : > { %v285_v50 = vmul.f32 %v245_v42, %v201_v43  ;;  %v286_v53 = vmul.f32 %v245_v42, %v202_v44  ;;  %v287_v55 = vmul.f32 %v245_v42, %v203_v48  ;;  %v267_v58 = vmul.f32 %v235_v51, %v183_v52  ;;  %v230_v42 = vld [vmem:[%s870_s28 + $0x178] sm:$0xff]  ;;  %v231_v44 = vld [vmem:[%s870_s28 + $0x180] sm:$0xff] }
  0x87   : > { %331 = vst [vmem:[%s879_s30 + $0x70] sm:$0xff] %v281_v45  ;;  %v268_v60 = vmul.f32 %v235_v51, %v184_v54  ;;  %v269_v62 = vmul.f32 %v235_v51, %v185_v56  ;;  %v270_v0 = vmul.f32 %v235_v51, %v186_v57  ;;  %v271_v1 = vmul.f32 %v235_v51, %v187_v59 }
  0x88   : > { %332 = vst [vmem:[%s879_s30 + $0x78] sm:$0xff] %v282_v46  ;;  %v272_v4 = vmul.f32 %v235_v51, %v188_v61  ;;  %v273_v6 = vmul.f32 %v235_v51, %v189_v63 }
  0x89   : > { %333 = vst [vmem:[%s879_s30 + $0x80] sm:$0xff] %v283_v47 }
  0x8a   : > { %334 = vst [vmem:[%s879_s30 + $0x88] sm:$0xff] %v284_v49 }
  0x8b   : > { %335 = vst [vmem:[%s879_s30 + $0x90] sm:$0xff] %v285_v50 }
  0x8c   : > { %336 = vst [vmem:[%s879_s30 + $0x98] sm:$0xff] %v286_v53  ;;  %v250_v2 = vpop.permute.xlu1 %249 }
  0x8d   : > { %337 = vst.msk [vmem:[%s879_s30 + $0xa0] sm:$0xff] %vm322_vm0, %v287_v55  ;;  %v288_v9 = vmul.f32 %v250_v2, %v204_v3  ;;  %v289_v11 = vmul.f32 %v250_v2, %v205_v5  ;;  %v240_v12 = vpop.permute.xlu0 %239  ;;  %v290_v14 = vmul.f32 %v250_v2, %v206_v7  ;;  %v291_v16 = vmul.f32 %v250_v2, %v207_v8 }
  0x8e   : > { %316 = vst [vmem:[%s879_s30] sm:$0xff] %v267_v58  ;;  %v292_v17 = vmul.f32 %v250_v2, %v208_v10  ;;  %v293_v19 = vmul.f32 %v250_v2, %v209_v13  ;;  %v294_v21 = vmul.f32 %v250_v2, %v210_v15  ;;  %v274_v24 = vmul.f32 %v240_v12, %v190_v18 }
  0x8f   : > { %317 = vst [vmem:[%s879_s30 + $0x8] sm:$0xff] %v268_v60  ;;  %v275_v26 = vmul.f32 %v240_v12, %v191_v20  ;;  %v276_v28 = vmul.f32 %v240_v12, %v192_v22  ;;  %v277_v30 = vmul.f32 %v240_v12, %v193_v23  ;;  %v278_v31 = vmul.f32 %v240_v12, %v194_v25 }
  0x90   : > { %318 = vst [vmem:[%s879_s30 + $0x10] sm:$0xff] %v269_v62  ;;  %v279_v34 = vmul.f32 %v240_v12, %v195_v27  ;;  %v280_v36 = vmul.f32 %v240_v12, %v196_v29 }
  0x91   : > { %319 = vst [vmem:[%s879_s30 + $0x18] sm:$0xff] %v270_v0 }
  0x92   : > { %320 = vst [vmem:[%s879_s30 + $0x20] sm:$0xff] %v271_v1 }
  0x93   : > { %321 = vst [vmem:[%s879_s30 + $0x28] sm:$0xff] %v272_v4 }
  0x94   : > { %323 = vst.msk [vmem:[%s879_s30 + $0x30] sm:$0xff] %vm322_vm0, %v273_v6 }
  0x95   : > { %338 = vst [vmem:[%s879_s30 + $0xa8] sm:$0xff] %v288_v9  ;;  %v265_v32 = vpop.permute.xlu0 %264 }
  0x96   : > { %339 = vst [vmem:[%s879_s30 + $0xb0] sm:$0xff] %v289_v11  ;;  %v309_v39 = vmul.f32 %v265_v32, %v225_v33  ;;  %v310_v41 = vmul.f32 %v265_v32, %v226_v35  ;;  %v311_v43 = vmul.f32 %v265_v32, %v227_v37  ;;  %v312_v45 = vmul.f32 %v265_v32, %v228_v38 }
  0x97   : > { %340 = vst [vmem:[%s879_s30 + $0xb8] sm:$0xff] %v290_v14  ;;  %v313_v46 = vmul.f32 %v265_v32, %v229_v40  ;;  %v314_v47 = vmul.f32 %v265_v32, %v230_v42  ;;  %v315_v48 = vmul.f32 %v265_v32, %v231_v44 }
  0x98   : > { %341 = vst [vmem:[%s879_s30 + $0xc0] sm:$0xff] %v291_v16 }
  0x99   : > { %342 = vst [vmem:[%s879_s30 + $0xc8] sm:$0xff] %v292_v17 }
  0x9a   : > { %343 = vst [vmem:[%s879_s30 + $0xd0] sm:$0xff] %v293_v19 }
  0x9b   : > { %344 = vst.msk [vmem:[%s879_s30 + $0xd8] sm:$0xff] %vm322_vm0, %v294_v21 }
  0x9c   : > { %324 = vst [vmem:[%s879_s30 + $0x38] sm:$0xff] %v274_v24 }
  0x9d   : > { %325 = vst [vmem:[%s879_s30 + $0x40] sm:$0xff] %v275_v26 }
  0x9e   : > { %326 = vst [vmem:[%s879_s30 + $0x48] sm:$0xff] %v276_v28 }
  0x9f   : > { %327 = vst [vmem:[%s879_s30 + $0x50] sm:$0xff] %v277_v30 }
  0xa0   : > { %328 = vst [vmem:[%s879_s30 + $0x58] sm:$0xff] %v278_v31 }
  0xa1   : > { %329 = vst [vmem:[%s879_s30 + $0x60] sm:$0xff] %v279_v34 }
  0xa2   : > { %330 = vst.msk [vmem:[%s879_s30 + $0x68] sm:$0xff] %vm322_vm0, %v280_v36 }
  0xa3   : > { %359 = vst [vmem:[%s879_s30 + $0x150] sm:$0xff] %v309_v39 }
  0xa4   : > { %360 = vst [vmem:[%s879_s30 + $0x158] sm:$0xff] %v310_v41 }
  0xa5   : > { %361 = vst [vmem:[%s879_s30 + $0x160] sm:$0xff] %v311_v43  ;;  %372 = sbr.rel (!%p853_p4) target bundleno = 253 (0xfd), region = 32 }
  0xa6   : > { %362 = vst [vmem:[%s879_s30 + $0x168] sm:$0xff] %v312_v45 }
  0xa7   : > { %363 = vst [vmem:[%s879_s30 + $0x170] sm:$0xff] %v313_v46 }
  0xa8   : > { %364 = vst [vmem:[%s879_s30 + $0x178] sm:$0xff] %v314_v47 }
  0xa9   : > { %365 = vst.msk [vmem:[%s879_s30 + $0x180] sm:$0xff] %vm322_vm0, %v315_v48 }
  0xaa   : > { %s1171_s3 = smov (!%p375_p8, %s374_s3), 7 }
  0xab   : > { %s611_s8 = smul.u32 56, %s1171_s3 }
  0xad   : > { %p614_p9 = scmp.eq.s32.totalorder %s611_s8, 0 }
  0xae   : > { %718 = sdivrem.u32 (!%p614_p9), %s1171_s3, 5 }
  0xaf   : > { %385 = sbr.rel (%p614_p9) target bundleno = 253 (0xfd), region = 36 }
  0xb7   : > { %s992_s9 = spop.drf %718 }
  0xb8   : > { %s720_s11 = spop.drf %718  ;;  %p615_p10 = scmp.le.s32.totalorder %s992_s9, 0 }
  0xb9   : > { %s1159_s12 = smov (!%p615_p10), %s986_s7  ;;  %s1160_s14 = smov (!%p615_p10), %s879_s30 }
  0xba   : > { %561 = sbr.rel (%p615_p10) target bundleno = 227 (0xe3), region = 85  ;;  %s1001_s15 = smov (!%p615_p10), 0  }
  0xbb   : > { %s1003_s17 = smov (!%p615_p10), 0  }
  0xbf LB: >> { %v399_v49 = vld [vmem:[%s786_s14] sm:$0xff]  ;;  %v401_v50 = vld [vmem:[%s786_s14 + $0x38] sm:$0xff]  ;;  %v403_v51 = vld [vmem:[%s786_s14 + $0x70] sm:$0xff]  ;;  %s469_s18 = sadd.s32 1, %s790_s15  ;;  %s393_s17 = sadd.s32 1, %s794_s17   ;;  %s794_s17 = sphi %s1003_s17, %s393_s17   ;;  %s790_s15 = sphi %s1001_s15, %s1163_s15   ;;  %s786_s14 = sphi %s1160_s14, %s1162_s14   ;;  %s782_s12 = sphi %s1159_s12, %s1161_s12  }
  0xc0   : >> { %400 = vst [vmem:[%s782_s12] sm:$0xff] %v399_v49  ;;  %v405_v52 = vld [vmem:[%s786_s14 + $0xa8] sm:$0xff]  ;;  %p470_p11 = scmp.ge.s32.totalorder %s469_s18, %s992_s9  ;;  %v407_v53 = vld [vmem:[%s786_s14 + $0xe0] sm:$0xff]  ;;  %v413_v56 = vld [vmem:[%s786_s14 + $0x78] sm:$0xff]  ;;  %p392_p12 = scmp.ge.s32.totalorder %s393_s17, %s992_s9 }
  0xc1   : >> { %402 = vst [vmem:[%s782_s12 + $0x38] sm:$0xff] %v401_v50  ;;  %v409_v54 = vld [vmem:[%s786_s14 + $0x8] sm:$0xff]  ;;  %v411_v55 = vld [vmem:[%s786_s14 + $0x40] sm:$0xff]  ;;  %v415_v57 = vld [vmem:[%s786_s14 + $0xb0] sm:$0xff] }
  0xc2   : >> { %404 = vst [vmem:[%s782_s12 + $0x70] sm:$0xff] %v403_v51  ;;  %s1173_s18 = smov (%p470_p11, %s469_s18), 0  ;;  %v417_v58 = vld [vmem:[%s786_s14 + $0xe8] sm:$0xff]  ;;  %v419_v59 = vld [vmem:[%s786_s14 + $0x10] sm:$0xff]  ;;  %v423_v61 = vld [vmem:[%s786_s14 + $0x80] sm:$0xff] }
  0xc3   : >> { %406 = vst [vmem:[%s782_s12 + $0xa8] sm:$0xff] %v405_v52  ;;  %s472_s19 = smul.u32 280, %s1173_s18  ;;  %v421_v60 = vld [vmem:[%s786_s14 + $0x48] sm:$0xff]  ;;  %v425_v62 = vld [vmem:[%s786_s14 + $0xb8] sm:$0xff]  ;;  %v427_v63 = vld [vmem:[%s786_s14 + $0xf0] sm:$0xff]  ;;  %s1163_s15 = smov %s1173_s18 }
  0xc4   : >> { %408 = vst [vmem:[%s782_s12 + $0xe0] sm:$0xff] %v407_v53  ;;  %v429_v0 = vld [vmem:[%s786_s14 + $0x18] sm:$0xff]  ;;  %v431_v1 = vld [vmem:[%s786_s14 + $0x50] sm:$0xff]  ;;  %v433_v2 = vld [vmem:[%s786_s14 + $0x88] sm:$0xff] }
  0xc5   : >> { %410 = vst [vmem:[%s782_s12 + $0x8] sm:$0xff] %v409_v54  ;;  %s1037_s20 = scalar_lea.vmem %s879_s30, %s472_s19 [#allocation2]   ;;  %s1040_s21 = scalar_lea.vmem %s986_s7, %s472_s19   ;;  %v435_v3 = vld [vmem:[%s786_s14 + $0xc0] sm:$0xff]  ;;  %v437_v4 = vld [vmem:[%s786_s14 + $0xf8] sm:$0xff]  ;;  %v443_v7 = vld [vmem:[%s786_s14 + $0x90] sm:$0xff] }
  0xc6   : >> { %412 = vst [vmem:[%s782_s12 + $0x40] sm:$0xff] %v411_v55  ;;  %v439_v5 = vld [vmem:[%s786_s14 + $0x20] sm:$0xff]  ;;  %v441_v6 = vld [vmem:[%s786_s14 + $0x58] sm:$0xff]  ;;  %v445_v8 = vld [vmem:[%s786_s14 + $0xc8] sm:$0xff] }
  0xc7   : >> { %414 = vst [vmem:[%s782_s12 + $0x78] sm:$0xff] %v413_v56  ;;  %v447_v9 = vld [vmem:[%s786_s14 + $0x100] sm:$0xff]  ;;  %v449_v10 = vld [vmem:[%s786_s14 + $0x28] sm:$0xff]  ;;  %v453_v12 = vld [vmem:[%s786_s14 + $0x98] sm:$0xff] }
  0xc8   : >> { %416 = vst [vmem:[%s782_s12 + $0xb0] sm:$0xff] %v415_v57  ;;  %v451_v11 = vld [vmem:[%s786_s14 + $0x60] sm:$0xff]  ;;  %v455_v13 = vld [vmem:[%s786_s14 + $0xd0] sm:$0xff]  ;;  %v457_v14 = vld [vmem:[%s786_s14 + $0x108] sm:$0xff] }
  0xc9   : >> { %418 = vst [vmem:[%s782_s12 + $0xe8] sm:$0xff] %v417_v58  ;;  %v459_v15 = vld [vmem:[%s786_s14 + $0x30] sm:$0xff]  ;;  %v461_v16 = vld [vmem:[%s786_s14 + $0x68] sm:$0xff]  ;;  %v463_v17 = vld [vmem:[%s786_s14 + $0xa0] sm:$0xff] }
  0xca   : >> { %420 = vst [vmem:[%s782_s12 + $0x10] sm:$0xff] %v419_v59  ;;  %v465_v18 = vld [vmem:[%s786_s14 + $0xd8] sm:$0xff]  ;;  %v467_v19 = vld [vmem:[%s786_s14 + $0x110] sm:$0xff]  ;;  %s1162_s14 = smov %s1037_s20 }
  0xcb   : >> { %422 = vst [vmem:[%s782_s12 + $0x48] sm:$0xff] %v421_v60 }
  0xcc   : >> { %424 = vst [vmem:[%s782_s12 + $0x80] sm:$0xff] %v423_v61 }
  0xcd   : >> { %426 = vst [vmem:[%s782_s12 + $0xb8] sm:$0xff] %v425_v62 }
  0xce   : >> { %428 = vst [vmem:[%s782_s12 + $0xf0] sm:$0xff] %v427_v63 }
  0xcf   : >> { %430 = vst [vmem:[%s782_s12 + $0x18] sm:$0xff] %v429_v0 }
  0xd0   : >> { %432 = vst [vmem:[%s782_s12 + $0x50] sm:$0xff] %v431_v1 }
  0xd1   : >> { %434 = vst [vmem:[%s782_s12 + $0x88] sm:$0xff] %v433_v2 }
  0xd2   : >> { %436 = vst [vmem:[%s782_s12 + $0xc0] sm:$0xff] %v435_v3 }
  0xd3   : >> { %438 = vst [vmem:[%s782_s12 + $0xf8] sm:$0xff] %v437_v4 }
  0xd4   : >> { %440 = vst [vmem:[%s782_s12 + $0x20] sm:$0xff] %v439_v5 }
  0xd5   : >> { %442 = vst [vmem:[%s782_s12 + $0x58] sm:$0xff] %v441_v6 }
  0xd6   : >> { %444 = vst [vmem:[%s782_s12 + $0x90] sm:$0xff] %v443_v7 }
  0xd7   : >> { %446 = vst [vmem:[%s782_s12 + $0xc8] sm:$0xff] %v445_v8 }
  0xd8   : >> { %448 = vst [vmem:[%s782_s12 + $0x100] sm:$0xff] %v447_v9 }
  0xd9   : >> { %450 = vst [vmem:[%s782_s12 + $0x28] sm:$0xff] %v449_v10 }
  0xda   : >> { %452 = vst [vmem:[%s782_s12 + $0x60] sm:$0xff] %v451_v11 }
  0xdb   : >> { %454 = vst [vmem:[%s782_s12 + $0x98] sm:$0xff] %v453_v12 }
  0xdc   : >> { %456 = vst [vmem:[%s782_s12 + $0xd0] sm:$0xff] %v455_v13 }
  0xdd   : >> { %458 = vst [vmem:[%s782_s12 + $0x108] sm:$0xff] %v457_v14 }
  0xde   : >> { %460 = vst [vmem:[%s782_s12 + $0x30] sm:$0xff] %v459_v15  ;;  %395 = sbr.rel (!%p392_p12) target bundleno = 191 (0xbf), region = 91 }
  0xdf   : >> { %462 = vst [vmem:[%s782_s12 + $0x68] sm:$0xff] %v461_v16 }
  0xe0   : >> { %464 = vst [vmem:[%s782_s12 + $0xa0] sm:$0xff] %v463_v17 }
  0xe1   : >> { %466 = vst [vmem:[%s782_s12 + $0xd8] sm:$0xff] %v465_v18 }
  0xe2   : >> { %468 = vst [vmem:[%s782_s12 + $0x110] sm:$0xff] %v467_v19  ;;  %s1161_s12 = smov %s1040_s21 }
  0xe3 PF: > { %721 = sdivrem.u32 %s1171_s3, 5 }
  0xe4   : > { %s616_s22 = smul.u32 280, %s992_s9 }
  0xe6   : > { %s1111_s23 = scalar_lea.vmem %s879_s30, %s616_s22 [#allocation2]   ;;  %s1114_s24 = scalar_lea.vmem %s986_s7, %s616_s22  }
  0xec   : > { %s722_s25 = spop.drf %721 }
  0xed   : > { %s1116_s26 = spop.drf %721 }
  0xee   : > { %p618_p13 = scmp.le.s32.totalorder %s1116_s26, 0 }
  0xef   : > { %s1164_s27 = smov (!%p618_p13), %s1114_s24  ;;  %s1165_s28 = smov (!%p618_p13), %s1111_s23 }
  0xf0   : > { %575 = sbr.rel (%p618_p13) target bundleno = 253 (0xfd), region = 96  ;;  %s1125_s29 = smov (!%p618_p13), 0  }
  0xf1   : > { %s1127_s3 = smov (!%p618_p13), 0  }
  0xf5 LB: >> { %v492_v20 = vld [vmem:[%s802_s28] sm:$0xff]  ;;  %v494_v21 = vld [vmem:[%s802_s28 + $0x8] sm:$0xff]  ;;  %v496_v22 = vld [vmem:[%s802_s28 + $0x10] sm:$0xff]  ;;  %s506_s30 = sadd.s32 1, %s806_s29  ;;  %s486_s3 = sadd.s32 1, %s810_s3   ;;  %s810_s3 = sphi %s1127_s3, %s486_s3   ;;  %s806_s29 = sphi %s1125_s29, %s1166_s29   ;;  %s802_s28 = sphi %s1165_s28, %s511_s28   ;;  %s798_s27 = sphi %s1164_s27, %s512_s27  }
  0xf6   : >> { %493 = vst [vmem:[%s798_s27] sm:$0xff] %v492_v20  ;;  %v498_v23 = vld [vmem:[%s802_s28 + $0x18] sm:$0xff]  ;;  %p507_p0 = scmp.ge.s32.totalorder %s506_s30, %s1116_s26  ;;  %v500_v24 = vld [vmem:[%s802_s28 + $0x20] sm:$0xff]  ;;  %v502_v25 = vld [vmem:[%s802_s28 + $0x28] sm:$0xff]  ;;  %p485_p1 = scmp.ge.s32.totalorder %s486_s3, %s1116_s26 }
  0xf7   : >> { %495 = vst [vmem:[%s798_s27 + $0x8] sm:$0xff] %v494_v21  ;;  %v504_v26 = vld [vmem:[%s802_s28 + $0x30] sm:$0xff] }
  0xf8   : >> { %497 = vst [vmem:[%s798_s27 + $0x10] sm:$0xff] %v496_v22  ;;  %s1175_s30 = smov (%p507_p0, %s506_s30), 0  ;;  %488 = sbr.rel (!%p485_p1) target bundleno = 245 (0xf5), region = 102 }
  0xf9   : >> { %499 = vst [vmem:[%s798_s27 + $0x18] sm:$0xff] %v498_v23  ;;  %s509_s4 = smul.u32 56, %s1175_s30  ;;  %s1166_s29 = smov %s1175_s30 }
  0xfa   : >> { %501 = vst [vmem:[%s798_s27 + $0x20] sm:$0xff] %v500_v24 }
  0xfb   : >> { %503 = vst [vmem:[%s798_s27 + $0x28] sm:$0xff] %v502_v25  ;;  %s511_s28 = scalar_lea.vmem %s1111_s23, %s509_s4 [#allocation2]  }
  0xfc   : >> { %505 = vst [vmem:[%s798_s27 + $0x30] sm:$0xff] %v504_v26  ;;  %s512_s27 = scalar_lea.vmem %s1114_s24, %s509_s4  }
  0xfd PF: > { %p9_p2 = scmp.ge.s32.totalorder %s843_s13, 4   ;;  %s1167_s9 = smov %s774_s10 }
  0xfe   : > { %s1168_s10 = smov %s851_s16  ;;  %s1169_s11 = smov %s843_s13 }
  0xff   :  { %11 = sbr.rel (!%p9_p2) target bundleno = 2 (0x2), region = 113 }

</bundles_post_ra>
